<compile_context>
chip_gen: v6e
topology: v6e:2x2x1
jax: 0.10.0
libtpu: 0.0.40
codegen_flags: <defaults>
</compile_context>

<pallas_src>
import math
import functools

import jax
import jax.numpy as jnp
from jax.experimental import pallas as pl
from jax.experimental.pallas import tpu as pltpu


# --------------------------- tiled projection matmul ---------------------------

def _linear_kernel(x_ref, w_ref, o_ref, acc_ref):
    """o = x @ w.T (w in torch (out,in) layout); K is the innermost reduction axis."""
    @pl.when(pl.program_id(2) == 0)
    def _():
        acc_ref[...] = jnp.zeros_like(acc_ref)

    acc_ref[...] += jax.lax.dot_general(
        x_ref[...], w_ref[...],
        dimension_numbers=(((1,), (1,)), ((), ())),
        preferred_element_type=jnp.float32)

    @pl.when(pl.program_id(2) == pl.num_programs(2) - 1)
    def _():
        o_ref[...] = acc_ref[...].astype(o_ref.dtype)


def _pick_tile(full, pref, align):
    t = min(pref, full)
    if t % align == 0 and full % t == 0:
        return t
    # TODO(synk): support ragged dims with a masked tail block instead of
    # falling back to the full extent.
    return full


def linear(x2d, w, *, tm=256, tn=256, tk=512):
    """y = x2d @ w.T, w in torch nn.Linear layout (out_features, in_features)."""
    M, K = x2d.shape
    N = w.shape[0]
    tm = _pick_tile(M, tm, 8)
    tn = _pick_tile(N, tn, 128)
    tk = _pick_tile(K, tk, 128)
    grid = (M // tm, N // tn, K // tk)
    bytes_el = x2d.dtype.itemsize
    return pl.pallas_call(
        _linear_kernel,
        out_shape=jax.ShapeDtypeStruct((M, N), x2d.dtype),
        grid=grid,
        in_specs=[
            pl.BlockSpec((tm, tk), lambda i, j, k: (i, k)),
            pl.BlockSpec((tn, tk), lambda i, j, k: (j, k)),
        ],
        out_specs=pl.BlockSpec((tm, tn), lambda i, j, k: (i, j)),
        scratch_shapes=[pltpu.VMEM((tm, tn), jnp.float32)],
        compiler_params=pltpu.CompilerParams(
            dimension_semantics=("parallel", "parallel", "arbitrary")),
        cost_estimate=pl.CostEstimate(
            flops=2 * M * N * K,
            transcendentals=0,
            bytes_accessed=bytes_el * (M * K + N * K + M * N)),
    )(x2d, w)


# ----------------------- flash attention (GQA-packed, L-tiled) -----------------

def _flash_attn_kernel(q_ref, k_ref, v_ref, o_ref, m_sc, l_sc, acc_sc, *,
                       scale, start_pos, seqlen, block_l):
    li = pl.program_id(2)

    @pl.when(li == 0)
    def _():
        m_sc[...] = jnp.full_like(m_sc, -jnp.inf)
        l_sc[...] = jnp.zeros_like(l_sc)
        acc_sc[...] = jnp.zeros_like(acc_sc)

    q = q_ref[...] * scale          # fold 1/sqrt(D) into Q: R*D muls, not R*L
    k = k_ref[...]                  # (tl, D)
    v = v_ref[...]                  # (tl, D)

    s = jax.lax.dot_general(        # (R, tl) = q @ k^T
        q, k, dimension_numbers=(((1,), (1,)), ((), ())),
        preferred_element_type=jnp.float32)

    # causal / prefix mask generated in-kernel (no dense (S, L) mask in HBM).
    # Packed row index = rep * seqlen + s  ->  query position = start_pos + s.
    row = jax.lax.broadcasted_iota(jnp.int32, s.shape, 0)
    col = jax.lax.broadcasted_iota(jnp.int32, s.shape, 1)
    q_pos = start_pos + row % seqlen
    k_pos = li * block_l + col
    s = jnp.where(k_pos <= q_pos, s, -1e30)

    # online softmax update
    m_prev = m_sc[...]
    m_new = jnp.maximum(m_prev, jnp.max(s, axis=-1, keepdims=True))
    alpha = jnp.exp(m_prev - m_new)
    p = jnp.exp(s - m_new)
    l_sc[...] = alpha * l_sc[...] + jnp.sum(p, axis=-1, keepdims=True)
    acc_sc[...] = alpha * acc_sc[...] + jnp.dot(
        p.astype(v.dtype), v, preferred_element_type=jnp.float32)
    m_sc[...] = m_new

    @pl.when(li == pl.num_programs(2) - 1)
    def _():
        # normalize after the PV matmul (R*D elements instead of R*L);
        # use approx=True in production to push the reciprocal onto the EUP.
        o_ref[...] = (acc_sc[...] * pl.reciprocal(l_sc[...], approx=False)
                      ).astype(o_ref.dtype)


def flash_attention(q, k, v, *, start_pos, seqlen, block_l=512):
    """q: (B, G, n_rep*S, D) packed per KV group; k, v: (B, G, L, D)."""
    B, G, R, D = q.shape
    L = k.shape[2]
    tl = min(block_l, L)
    if L % tl:
        # TODO(synk): handle ragged L with a masked tail block; fall back to a
        # single full-L block for now.
        tl = L
    grid = (B, G, L // tl)
    scale = 1.0 / math.sqrt(D)
    kernel = functools.partial(_flash_attn_kernel, scale=scale,
                               start_pos=start_pos, seqlen=seqlen, block_l=tl)
    bytes_el = q.dtype.itemsize
    return pl.pallas_call(
        kernel,
        out_shape=jax.ShapeDtypeStruct((B, G, R, D), q.dtype),
        grid=grid,
        in_specs=[
            pl.BlockSpec((None, None, R, D), lambda b, g, l: (b, g, 0, 0)),
            pl.BlockSpec((None, None, tl, D), lambda b, g, l: (b, g, l, 0)),
            pl.BlockSpec((None, None, tl, D), lambda b, g, l: (b, g, l, 0)),
        ],
        out_specs=pl.BlockSpec((None, None, R, D), lambda b, g, l: (b, g, 0, 0)),
        scratch_shapes=[
            pltpu.VMEM((R, 1), jnp.float32),   # running max
            pltpu.VMEM((R, 1), jnp.float32),   # running denominator
            pltpu.VMEM((R, D), jnp.float32),   # running numerator
        ],
        compiler_params=pltpu.CompilerParams(
            dimension_semantics=("parallel", "parallel", "arbitrary")),
        cost_estimate=pl.CostEstimate(
            flops=4 * B * G * R * L * D,
            transcendentals=B * G * R * L,
            bytes_accessed=bytes_el * (2 * B * G * R * D + 2 * B * G * L * D)),
    )(q, k, v)


# ------------------------------ JAX glue --------------------------------

def apply_rope(x, cos, sin):
    """x: (B, S, H, D); cos/sin: (S, D//2). Interleaved (real, imag) pairs in D,
    matching torch.view_as_complex semantics (rope computed in f32)."""
    B, S, H, D = x.shape
    xf = x.astype(jnp.float32).reshape(B, S, H, D // 2, 2)
    a, b = xf[..., 0], xf[..., 1]
    c = cos[None, :, None, :]
    s = sin[None, :, None, :]
    oa = a * c - b * s
    ob = a * s + b * c
    out = jnp.stack([oa, ob], axis=-1).reshape(B, S, H, D)
    return out.astype(x.dtype)
# TODO(synk): fuse RoPE (and the KV-cache write) into the wq/wk projection
# epilogue to remove the extra HBM round-trips of the stack/reshape temporaries.


def _attention_forward(params, cache_k, cache_v, x, start_pos, cos, sin,
                       n_heads, n_kv_heads, block_l=512):
    B, S, dim = x.shape
    head_dim = dim // n_heads
    n_rep = n_heads // n_kv_heads

    x2d = x.reshape(B * S, dim)
    xq = linear(x2d, params["wq"]).reshape(B, S, n_heads, head_dim)
    xk = linear(x2d, params["wk"]).reshape(B, S, n_kv_heads, head_dim)
    xv = linear(x2d, params["wv"]).reshape(B, S, n_kv_heads, head_dim)

    xq = apply_rope(xq, cos, sin)
    xk = apply_rope(xk, cos, sin)

    # in-place (donated) functional cache update:
    #   cache[:B, start_pos:start_pos+S] = xk / xv
    cache_k = jax.lax.dynamic_update_slice(
        cache_k, xk.astype(cache_k.dtype), (0, start_pos, 0, 0))
    cache_v = jax.lax.dynamic_update_slice(
        cache_v, xv.astype(cache_v.dtype), (0, start_pos, 0, 0))
    L = start_pos + S
    keys = cache_k[:B, :L]      # (B, L, H_kv, D)
    values = cache_v[:B, :L]

    # pack all n_rep query heads of a KV group into one sublane-major Q block
    q = jnp.transpose(xq, (0, 2, 1, 3)).reshape(B, n_kv_heads, n_rep * S, head_dim)
    k = jnp.transpose(keys, (0, 2, 1, 3))     # (B, H_kv, L, D)
    v = jnp.transpose(values, (0, 2, 1, 3))

    out = flash_attention(q, k, v, start_pos=start_pos, seqlen=S, block_l=block_l)
    out = out.reshape(B, n_kv_heads, n_rep, S, head_dim)
    out = jnp.transpose(out, (0, 3, 1, 2, 4)).reshape(B * S, n_heads * head_dim)
    out = linear(out, params["wo"]).reshape(B, S, dim)
    return out, cache_k, cache_v


attention_forward = jax.jit(
    _attention_forward,
    static_argnames=("start_pos", "n_heads", "n_kv_heads", "block_l"),
    donate_argnums=(1, 2),      # cache_k / cache_v updated in place
)


# --------------------------- pure-JAX reference --------------------------

def reference_forward(params, cache_k, cache_v, x, start_pos, cos, sin,
                      n_heads, n_kv_heads):
    B, S, dim = x.shape
    head_dim = dim // n_heads
    n_rep = n_heads // n_kv_heads
    xq = (x @ params["wq"].T).reshape(B, S, n_heads, head_dim)
    xk = (x @ params["wk"].T).reshape(B, S, n_kv_heads, head_dim)
    xv = (x @ params["wv"].T).reshape(B, S, n_kv_heads, head_dim)
    xq = apply_rope(xq, cos, sin)
    xk = apply_rope(xk, cos, sin)
    cache_k = jax.lax.dynamic_update_slice(cache_k, xk, (0, start_pos, 0, 0))
    cache_v = jax.lax.dynamic_update_slice(cache_v, xv, (0, start_pos, 0, 0))
    L = start_pos + S
    keys = jnp.repeat(cache_k[:B, :L], n_rep, axis=2)     # repeat_interleave
    values = jnp.repeat(cache_v[:B, :L], n_rep, axis=2)
    q = jnp.transpose(xq, (0, 2, 1, 3))
    k = jnp.transpose(keys, (0, 2, 1, 3))
    v = jnp.transpose(values, (0, 2, 1, 3))
    scores = (q @ jnp.swapaxes(k, 2, 3)) / math.sqrt(head_dim)
    causal = jnp.triu(jnp.full((S, S), float("-inf"), jnp.float32), k=1)
    mask = jnp.concatenate([jnp.zeros((S, start_pos), jnp.float32), causal], axis=1)
    scores = scores + mask[None, None]
    scores = jax.nn.softmax(scores.astype(jnp.float32), axis=-1).astype(q.dtype)
    out = scores @ v
    out = jnp.transpose(out, (0, 2, 1, 3)).reshape(B, S, -1)
    return out @ params["wo"].T


# -------------------------------- main -----------------------------------

if __name__ == "__main__":
    # small ModelArgs-consistent config
    dim, n_heads, n_kv_heads = 32, 4, 2
    head_dim = dim // n_heads          # 8
    max_batch, cache_len = 2, 32
    B, S, start_pos = 2, 8, 8          # L = 16 -> two key blocks with block_l=8
    theta = 500000.0

    key = jax.random.PRNGKey(0)
    ks = jax.random.split(key, 5)

    def init_w(k, out_f, in_f):        # nn.Linear-style uniform init (bias=False)
        bound = 1.0 / math.sqrt(in_f)
        return jax.random.uniform(k, (out_f, in_f), jnp.float32, -bound, bound)

    params = {
        "wq": init_w(ks[0], n_heads * head_dim, dim),
        "wk": init_w(ks[1], n_kv_heads * head_dim, dim),
        "wv": init_w(ks[2], n_kv_heads * head_dim, dim),
        "wo": init_w(ks[3], dim, n_heads * head_dim),
    }
    x = jax.random.normal(ks[4], (B, S, dim), jnp.float32)

    cache_k = jnp.zeros((max_batch, cache_len, n_kv_heads, head_dim), jnp.float32)
    cache_v = jnp.zeros((max_batch, cache_len, n_kv_heads, head_dim), jnp.float32)

    # freqs_cis (as cos/sin) for positions [start_pos, start_pos + S)
    inv_freq = 1.0 / (theta ** (jnp.arange(0, head_dim, 2, dtype=jnp.float32) / head_dim))
    t = jnp.arange(start_pos, start_pos + S, dtype=jnp.float32)
    angles = jnp.outer(t, inv_freq)                       # (S, head_dim // 2)
    cos, sin = jnp.cos(angles), jnp.sin(angles)

    # reference first (the Pallas call donates the caches)
    ref = reference_forward(params, cache_k, cache_v, x, start_pos,
                            cos, sin, n_heads, n_kv_heads)

    out, _, _ = attention_forward(
        params, cache_k, cache_v, x,
        start_pos=start_pos, cos=cos, sin=sin,
        n_heads=n_heads, n_kv_heads=n_kv_heads, block_l=8)
    out = jax.block_until_ready(out)

    assert out.shape == (B, S, dim)
    max_err = float(jnp.max(jnp.abs(out - ref)))
    assert jnp.allclose(out, ref, atol=1e-4, rtol=1e-4), max_err
    print("KERNEL_OK")
</pallas_src>

<mosaic_0001>
module attributes {stable_mosaic.version = 11 : i64} {
  func.func @_linear_kernel(%arg0: i32, %arg1: i32, %arg2: i32, %arg3: memref<16x32xf32, #tpu.memory_space<vmem>>, %arg4: memref<16x32xf32, #tpu.memory_space<vmem>>, %arg5: memref<16x16xf32, #tpu.memory_space<vmem>>, %arg6: memref<16x16xf32, #tpu.memory_space<vmem>>) attributes {dimension_semantics = [#tpu.dimension_semantics<parallel>, #tpu.dimension_semantics<parallel>, #tpu.dimension_semantics<arbitrary>], iteration_bounds = array<i64: 1, 1, 1>, scalar_prefetch = 0 : i64, scratch_operands = 1 : i64, tpu.core_type = #tpu.core_type<tc>, window_params = [{transform_indices = @transform_0, window_bounds = array<i64: 16, 32>}, {transform_indices = @transform_1, window_bounds = array<i64: 16, 32>}, {transform_indices = @transform_2, window_bounds = array<i64: 16, 16>}]} {
    %c0_i32 = arith.constant 0 : i32
    %0 = arith.cmpi eq, %arg2, %c0_i32 : i32
    %1 = arith.extui %0 : i1 to i32
    %c0_i32_0 = arith.constant 0 : i32
    %2 = arith.cmpi ne, %1, %c0_i32_0 : i32
    scf.if %2 {
      %cst_10 = arith.constant 0.000000e+00 : f32
      %12 = vector.broadcast %cst_10 : f32 to vector<16x16xf32>
      %c0_11 = arith.constant 0 : index
      %c0_12 = arith.constant 0 : index
      %13 = vector.load %arg6[%c0_11, %c0_12] : memref<16x16xf32, #tpu.memory_space<vmem>>, vector<16x16xf32>
      tpu.vector_store %arg6[%c0_11, %c0_12], %12 {strides = array<i32>} : memref<16x16xf32, #tpu.memory_space<vmem>>, vector<16x16xf32>,
    } else {
    }
    %c0 = arith.constant 0 : index
    %c0_1 = arith.constant 0 : index
    %3 = vector.load %arg6[%c0, %c0_1] : memref<16x16xf32, #tpu.memory_space<vmem>>, vector<16x16xf32>
    %c0_2 = arith.constant 0 : index
    %c0_3 = arith.constant 0 : index
    %4 = vector.load %arg3[%c0_2, %c0_3] : memref<16x32xf32, #tpu.memory_space<vmem>>, vector<16x32xf32>
    %c0_4 = arith.constant 0 : index
    %c0_5 = arith.constant 0 : index
    %5 = vector.load %arg4[%c0_4, %c0_5] : memref<16x32xf32, #tpu.memory_space<vmem>>, vector<16x32xf32>
    %cst = arith.constant dense<0.000000e+00> : vector<16x16xf32>
    %6 = tpu.matmul %4, %5, %cst {dimension_numbers = #tpu.dot_dimension_numbers<[1], [1], [0], [0], [0, 0, 1, 0], [], []>} : vector<16x32xf32>, vector<16x32xf32>, vector<16x16xf32> -> vector<16x16xf32>
    %7 = arith.addf %3, %6 : vector<16x16xf32>
    %c0_6 = arith.constant 0 : index
    %c0_7 = arith.constant 0 : index
    %8 = vector.load %arg6[%c0_6, %c0_7] : memref<16x16xf32, #tpu.memory_space<vmem>>, vector<16x16xf32>
    tpu.vector_store %arg6[%c0_6, %c0_7], %7 {strides = array<i32>} : memref<16x16xf32, #tpu.memory_space<vmem>>, vector<16x16xf32>,
    %c0_i32_8 = arith.constant 0 : i32
    %9 = arith.cmpi eq, %arg2, %c0_i32_8 : i32
    %10 = arith.extui %9 : i1 to i32
    %c0_i32_9 = arith.constant 0 : i32
    %11 = arith.cmpi ne, %10, %c0_i32_9 : i32
    scf.if %11 {
      %c0_10 = arith.constant 0 : index
      %c0_11 = arith.constant 0 : index
      %12 = vector.load %arg6[%c0_10, %c0_11] : memref<16x16xf32, #tpu.memory_space<vmem>>, vector<16x16xf32>
      %c0_12 = arith.constant 0 : index
      %c0_13 = arith.constant 0 : index
      %13 = vector.load %arg5[%c0_12, %c0_13] : memref<16x16xf32, #tpu.memory_space<vmem>>, vector<16x16xf32>
      tpu.vector_store %arg5[%c0_12, %c0_13], %12 {strides = array<i32>} : memref<16x16xf32, #tpu.memory_space<vmem>>, vector<16x16xf32>,
    } else {
    }
    return
  }
  func.func @transform_0(%arg0: i32, %arg1: i32, %arg2: i32) -> (i32, i32) {
    %c0_i32 = arith.constant 0 : i32
    return %arg0, %arg2 : i32, i32
  }
  func.func @transform_1(%arg0: i32, %arg1: i32, %arg2: i32) -> (i32, i32) {
    %c0_i32 = arith.constant 0 : i32
    return %arg1, %arg2 : i32, i32
  }
  func.func @transform_2(%arg0: i32, %arg1: i32, %arg2: i32) -> (i32, i32) {
    %c0_i32 = arith.constant 0 : i32
    return %arg0, %arg1 : i32, i32
  }
}

module attributes {stable_mosaic.version = 11 : i64} {
  func.func @_linear_kernel(%arg0: i32, %arg1: i32, %arg2: i32, %arg3: memref<16x32xf32, #tpu.memory_space<vmem>>, %arg4: memref<32x32xf32, #tpu.memory_space<vmem>>, %arg5: memref<16x32xf32, #tpu.memory_space<vmem>>, %arg6: memref<16x32xf32, #tpu.memory_space<vmem>>) attributes {dimension_semantics = [#tpu.dimension_semantics<parallel>, #tpu.dimension_semantics<parallel>, #tpu.dimension_semantics<arbitrary>], iteration_bounds = array<i64: 1, 1, 1>, scalar_prefetch = 0 : i64, scratch_operands = 1 : i64, tpu.core_type = #tpu.core_type<tc>, window_params = [{transform_indices = @transform_0, window_bounds = array<i64: 16, 32>}, {transform_indices = @transform_1, window_bounds = array<i64: 32, 32>}, {transform_indices = @transform_2, window_bounds = array<i64: 16, 32>}]} {
    %c0_i32 = arith.constant 0 : i32
    %0 = arith.cmpi eq, %arg2, %c0_i32 : i32
    %1 = arith.extui %0 : i1 to i32
    %c0_i32_0 = arith.constant 0 : i32
    %2 = arith.cmpi ne, %1, %c0_i32_0 : i32
    scf.if %2 {
      %cst_10 = arith.constant 0.000000e+00 : f32
      %12 = vector.broadcast %cst_10 : f32 to vector<16x32xf32>
      %c0_11 = arith.constant 0 : index
      %c0_12 = arith.constant 0 : index
      %13 = vector.load %arg6[%c0_11, %c0_12] : memref<16x32xf32, #tpu.memory_space<vmem>>, vector<16x32xf32>
      tpu.vector_store %arg6[%c0_11, %c0_12], %12 {strides = array<i32>} : memref<16x32xf32, #tpu.memory_space<vmem>>, vector<16x32xf32>,
    } else {
    }
    %c0 = arith.constant 0 : index
    %c0_1 = arith.constant 0 : index
    %3 = vector.load %arg6[%c0, %c0_1] : memref<16x32xf32, #tpu.memory_space<vmem>>, vector<16x32xf32>
    %c0_2 = arith.constant 0 : index
    %c0_3 = arith.constant 0 : index
    %4 = vector.load %arg3[%c0_2, %c0_3] : memref<16x32xf32, #tpu.memory_space<vmem>>, vector<16x32xf32>
    %c0_4 = arith.constant 0 : index
    %c0_5 = arith.constant 0 : index
    %5 = vector.load %arg4[%c0_4, %c0_5] : memref<32x32xf32, #tpu.memory_space<vmem>>, vector<32x32xf32>
    %cst = arith.constant dense<0.000000e+00> : vector<16x32xf32>
    %6 = tpu.matmul %4, %5, %cst {dimension_numbers = #tpu.dot_dimension_numbers<[1], [1], [0], [0], [0, 0, 1, 0], [], []>} : vector<16x32xf32>, vector<32x32xf32>, vector<16x32xf32> -> vector<16x32xf32>
    %7 = arith.addf %3, %6 : vector<16x32xf32>
    %c0_6 = arith.constant 0 : index
    %c0_7 = arith.constant 0 : index
    %8 = vector.load %arg6[%c0_6, %c0_7] : memref<16x32xf32, #tpu.memory_space<vmem>>, vector<16x32xf32>
    tpu.vector_store %arg6[%c0_6, %c0_7], %7 {strides = array<i32>} : memref<16x32xf32, #tpu.memory_space<vmem>>, vector<16x32xf32>,
    %c0_i32_8 = arith.constant 0 : i32
    %9 = arith.cmpi eq, %arg2, %c0_i32_8 : i32
    %10 = arith.extui %9 : i1 to i32
    %c0_i32_9 = arith.constant 0 : i32
    %11 = arith.cmpi ne, %10, %c0_i32_9 : i32
    scf.if %11 {
      %c0_10 = arith.constant 0 : index
      %c0_11 = arith.constant 0 : index
      %12 = vector.load %arg6[%c0_10, %c0_11] : memref<16x32xf32, #tpu.memory_space<vmem>>, vector<16x32xf32>
      %c0_12 = arith.constant 0 : index
      %c0_13 = arith.constant 0 : index
      %13 = vector.load %arg5[%c0_12, %c0_13] : memref<16x32xf32, #tpu.memory_space<vmem>>, vector<16x32xf32>
      tpu.vector_store %arg5[%c0_12, %c0_13], %12 {strides = array<i32>} : memref<16x32xf32, #tpu.memory_space<vmem>>, vector<16x32xf32>,
    } else {
    }
    return
  }
  func.func @transform_0(%arg0: i32, %arg1: i32, %arg2: i32) -> (i32, i32) {
    %c0_i32 = arith.constant 0 : i32
    return %arg0, %arg2 : i32, i32
  }
  func.func @transform_1(%arg0: i32, %arg1: i32, %arg2: i32) -> (i32, i32) {
    %c0_i32 = arith.constant 0 : i32
    return %arg1, %arg2 : i32, i32
  }
  func.func @transform_2(%arg0: i32, %arg1: i32, %arg2: i32) -> (i32, i32) {
    %c0_i32 = arith.constant 0 : i32
    return %arg0, %arg1 : i32, i32
  }
}

module attributes {stable_mosaic.version = 11 : i64} {
  func.func @_linear_kernel(%arg0: i32, %arg1: i32, %arg2: i32, %arg3: memref<16x32xf32, #tpu.memory_space<vmem>>, %arg4: memref<16x32xf32, #tpu.memory_space<vmem>>, %arg5: memref<16x16xf32, #tpu.memory_space<vmem>>, %arg6: memref<16x16xf32, #tpu.memory_space<vmem>>) attributes {dimension_semantics = [#tpu.dimension_semantics<parallel>, #tpu.dimension_semantics<parallel>, #tpu.dimension_semantics<arbitrary>], iteration_bounds = array<i64: 1, 1, 1>, scalar_prefetch = 0 : i64, scratch_operands = 1 : i64, tpu.core_type = #tpu.core_type<tc>, window_params = [{transform_indices = @transform_0, window_bounds = array<i64: 16, 32>}, {transform_indices = @transform_1, window_bounds = array<i64: 16, 32>}, {transform_indices = @transform_2, window_bounds = array<i64: 16, 16>}]} {
    %c0_i32 = arith.constant 0 : i32
    %0 = arith.cmpi eq, %arg2, %c0_i32 : i32
    %1 = arith.extui %0 : i1 to i32
    %c0_i32_0 = arith.constant 0 : i32
    %2 = arith.cmpi ne, %1, %c0_i32_0 : i32
    scf.if %2 {
      %cst_10 = arith.constant 0.000000e+00 : f32
      %12 = vector.broadcast %cst_10 : f32 to vector<16x16xf32>
      %c0_11 = arith.constant 0 : index
      %c0_12 = arith.constant 0 : index
      %13 = vector.load %arg6[%c0_11, %c0_12] : memref<16x16xf32, #tpu.memory_space<vmem>>, vector<16x16xf32>
      tpu.vector_store %arg6[%c0_11, %c0_12], %12 {strides = array<i32>} : memref<16x16xf32, #tpu.memory_space<vmem>>, vector<16x16xf32>,
    } else {
    }
    %c0 = arith.constant 0 : index
    %c0_1 = arith.constant 0 : index
    %3 = vector.load %arg6[%c0, %c0_1] : memref<16x16xf32, #tpu.memory_space<vmem>>, vector<16x16xf32>
    %c0_2 = arith.constant 0 : index
    %c0_3 = arith.constant 0 : index
    %4 = vector.load %arg3[%c0_2, %c0_3] : memref<16x32xf32, #tpu.memory_space<vmem>>, vector<16x32xf32>
    %c0_4 = arith.constant 0 : index
    %c0_5 = arith.constant 0 : index
    %5 = vector.load %arg4[%c0_4, %c0_5] : memref<16x32xf32, #tpu.memory_space<vmem>>, vector<16x32xf32>
    %cst = arith.constant dense<0.000000e+00> : vector<16x16xf32>
    %6 = tpu.matmul %4, %5, %cst {dimension_numbers = #tpu.dot_dimension_numbers<[1], [1], [0], [0], [0, 0, 1, 0], [], []>} : vector<16x32xf32>, vector<16x32xf32>, vector<16x16xf32> -> vector<16x16xf32>
    %7 = arith.addf %3, %6 : vector<16x16xf32>
    %c0_6 = arith.constant 0 : index
    %c0_7 = arith.constant 0 : index
    %8 = vector.load %arg6[%c0_6, %c0_7] : memref<16x16xf32, #tpu.memory_space<vmem>>, vector<16x16xf32>
    tpu.vector_store %arg6[%c0_6, %c0_7], %7 {strides = array<i32>} : memref<16x16xf32, #tpu.memory_space<vmem>>, vector<16x16xf32>,
    %c0_i32_8 = arith.constant 0 : i32
    %9 = arith.cmpi eq, %arg2, %c0_i32_8 : i32
    %10 = arith.extui %9 : i1 to i32
    %c0_i32_9 = arith.constant 0 : i32
    %11 = arith.cmpi ne, %10, %c0_i32_9 : i32
    scf.if %11 {
      %c0_10 = arith.constant 0 : index
      %c0_11 = arith.constant 0 : index
      %12 = vector.load %arg6[%c0_10, %c0_11] : memref<16x16xf32, #tpu.memory_space<vmem>>, vector<16x16xf32>
      %c0_12 = arith.constant 0 : index
      %c0_13 = arith.constant 0 : index
      %13 = vector.load %arg5[%c0_12, %c0_13] : memref<16x16xf32, #tpu.memory_space<vmem>>, vector<16x16xf32>
      tpu.vector_store %arg5[%c0_12, %c0_13], %12 {strides = array<i32>} : memref<16x16xf32, #tpu.memory_space<vmem>>, vector<16x16xf32>,
    } else {
    }
    return
  }
  func.func @transform_0(%arg0: i32, %arg1: i32, %arg2: i32) -> (i32, i32) {
    %c0_i32 = arith.constant 0 : i32
    return %arg0, %arg2 : i32, i32
  }
  func.func @transform_1(%arg0: i32, %arg1: i32, %arg2: i32) -> (i32, i32) {
    %c0_i32 = arith.constant 0 : i32
    return %arg1, %arg2 : i32, i32
  }
  func.func @transform_2(%arg0: i32, %arg1: i32, %arg2: i32) -> (i32, i32) {
    %c0_i32 = arith.constant 0 : i32
    return %arg0, %arg1 : i32, i32
  }
}

module attributes {stable_mosaic.version = 11 : i64} {
  func.func @_linear_kernel(%arg0: i32, %arg1: i32, %arg2: i32, %arg3: memref<16x32xf32, #tpu.memory_space<vmem>>, %arg4: memref<32x32xf32, #tpu.memory_space<vmem>>, %arg5: memref<16x32xf32, #tpu.memory_space<vmem>>, %arg6: memref<16x32xf32, #tpu.memory_space<vmem>>) attributes {dimension_semantics = [#tpu.dimension_semantics<parallel>, #tpu.dimension_semantics<parallel>, #tpu.dimension_semantics<arbitrary>], iteration_bounds = array<i64: 1, 1, 1>, scalar_prefetch = 0 : i64, scratch_operands = 1 : i64, tpu.core_type = #tpu.core_type<tc>, window_params = [{transform_indices = @transform_0, window_bounds = array<i64: 16, 32>}, {transform_indices = @transform_1, window_bounds = array<i64: 32, 32>}, {transform_indices = @transform_2, window_bounds = array<i64: 16, 32>}]} {
    %c0_i32 = arith.constant 0 : i32
    %0 = arith.cmpi eq, %arg2, %c0_i32 : i32
    %1 = arith.extui %0 : i1 to i32
    %c0_i32_0 = arith.constant 0 : i32
    %2 = arith.cmpi ne, %1, %c0_i32_0 : i32
    scf.if %2 {
      %cst_10 = arith.constant 0.000000e+00 : f32
      %12 = vector.broadcast %cst_10 : f32 to vector<16x32xf32>
      %c0_11 = arith.constant 0 : index
      %c0_12 = arith.constant 0 : index
      %13 = vector.load %arg6[%c0_11, %c0_12] : memref<16x32xf32, #tpu.memory_space<vmem>>, vector<16x32xf32>
      tpu.vector_store %arg6[%c0_11, %c0_12], %12 {strides = array<i32>} : memref<16x32xf32, #tpu.memory_space<vmem>>, vector<16x32xf32>,
    } else {
    }
    %c0 = arith.constant 0 : index
    %c0_1 = arith.constant 0 : index
    %3 = vector.load %arg6[%c0, %c0_1] : memref<16x32xf32, #tpu.memory_space<vmem>>, vector<16x32xf32>
    %c0_2 = arith.constant 0 : index
    %c0_3 = arith.constant 0 : index
    %4 = vector.load %arg3[%c0_2, %c0_3] : memref<16x32xf32, #tpu.memory_space<vmem>>, vector<16x32xf32>
    %c0_4 = arith.constant 0 : index
    %c0_5 = arith.constant 0 : index
    %5 = vector.load %arg4[%c0_4, %c0_5] : memref<32x32xf32, #tpu.memory_space<vmem>>, vector<32x32xf32>
    %cst = arith.constant dense<0.000000e+00> : vector<16x32xf32>
    %6 = tpu.matmul %4, %5, %cst {dimension_numbers = #tpu.dot_dimension_numbers<[1], [1], [0], [0], [0, 0, 1, 0], [], []>} : vector<16x32xf32>, vector<32x32xf32>, vector<16x32xf32> -> vector<16x32xf32>
    %7 = arith.addf %3, %6 : vector<16x32xf32>
    %c0_6 = arith.constant 0 : index
    %c0_7 = arith.constant 0 : index
    %8 = vector.load %arg6[%c0_6, %c0_7] : memref<16x32xf32, #tpu.memory_space<vmem>>, vector<16x32xf32>
    tpu.vector_store %arg6[%c0_6, %c0_7], %7 {strides = array<i32>} : memref<16x32xf32, #tpu.memory_space<vmem>>, vector<16x32xf32>,
    %c0_i32_8 = arith.constant 0 : i32
    %9 = arith.cmpi eq, %arg2, %c0_i32_8 : i32
    %10 = arith.extui %9 : i1 to i32
    %c0_i32_9 = arith.constant 0 : i32
    %11 = arith.cmpi ne, %10, %c0_i32_9 : i32
    scf.if %11 {
      %c0_10 = arith.constant 0 : index
      %c0_11 = arith.constant 0 : index
      %12 = vector.load %arg6[%c0_10, %c0_11] : memref<16x32xf32, #tpu.memory_space<vmem>>, vector<16x32xf32>
      %c0_12 = arith.constant 0 : index
      %c0_13 = arith.constant 0 : index
      %13 = vector.load %arg5[%c0_12, %c0_13] : memref<16x32xf32, #tpu.memory_space<vmem>>, vector<16x32xf32>
      tpu.vector_store %arg5[%c0_12, %c0_13], %12 {strides = array<i32>} : memref<16x32xf32, #tpu.memory_space<vmem>>, vector<16x32xf32>,
    } else {
    }
    return
  }
  func.func @transform_0(%arg0: i32, %arg1: i32, %arg2: i32) -> (i32, i32) {
    %c0_i32 = arith.constant 0 : i32
    return %arg0, %arg2 : i32, i32
  }
  func.func @transform_1(%arg0: i32, %arg1: i32, %arg2: i32) -> (i32, i32) {
    %c0_i32 = arith.constant 0 : i32
    return %arg1, %arg2 : i32, i32
  }
  func.func @transform_2(%arg0: i32, %arg1: i32, %arg2: i32) -> (i32, i32) {
    %c0_i32 = arith.constant 0 : i32
    return %arg0, %arg1 : i32, i32
  }
}

module attributes {stable_mosaic.version = 11 : i64} {
  func.func @_flash_attn_kernel(%arg0: i32, %arg1: i32, %arg2: i32, %arg3: memref<1x1x16x8xf32, #tpu.memory_space<vmem>>, %arg4: memref<1x1x8x8xf32, #tpu.memory_space<vmem>>, %arg5: memref<1x1x8x8xf32, #tpu.memory_space<vmem>>, %arg6: memref<1x1x16x8xf32, #tpu.memory_space<vmem>>, %arg7: memref<16x1xf32, #tpu.memory_space<vmem>>, %arg8: memref<16x1xf32, #tpu.memory_space<vmem>>, %arg9: memref<16x8xf32, #tpu.memory_space<vmem>>) attributes {dimension_semantics = [#tpu.dimension_semantics<parallel>, #tpu.dimension_semantics<parallel>, #tpu.dimension_semantics<arbitrary>], iteration_bounds = array<i64: 2, 2, 2>, scalar_prefetch = 0 : i64, scratch_operands = 3 : i64, tpu.core_type = #tpu.core_type<tc>, window_params = [{transform_indices = @transform_0, window_bounds = array<i64: 1, 1, 16, 8>}, {transform_indices = @transform_1, window_bounds = array<i64: 1, 1, 8, 8>}, {transform_indices = @transform_2, window_bounds = array<i64: 1, 1, 8, 8>}, {transform_indices = @transform_3, window_bounds = array<i64: 1, 1, 16, 8>}]} {
    %c0_i32 = arith.constant 0 : i32
    %0 = arith.cmpi eq, %arg2, %c0_i32 : i32
    %1 = arith.extui %0 : i1 to i32
    %c0_i32_0 = arith.constant 0 : i32
    %2 = arith.cmpi ne, %1, %c0_i32_0 : i32
    scf.if %2 {
      %cst_37 = arith.constant 0xFF800000 : f32
      %63 = vector.broadcast %cst_37 : f32 to vector<16x1xf32>
      %c0_38 = arith.constant 0 : index
      %c0_39 = arith.constant 0 : index
      %64 = vector.load %arg7[%c0_38, %c0_39] : memref<16x1xf32, #tpu.memory_space<vmem>>, vector<16x1xf32>
      tpu.vector_store %arg7[%c0_38, %c0_39], %63 {strides = array<i32>} : memref<16x1xf32, #tpu.memory_space<vmem>>, vector<16x1xf32>,
      %cst_40 = arith.constant 0.000000e+00 : f32
      %65 = vector.broadcast %cst_40 : f32 to vector<16x1xf32>
      %c0_41 = arith.constant 0 : index
      %c0_42 = arith.constant 0 : index
      %66 = vector.load %arg8[%c0_41, %c0_42] : memref<16x1xf32, #tpu.memory_space<vmem>>, vector<16x1xf32>
      tpu.vector_store %arg8[%c0_41, %c0_42], %65 {strides = array<i32>} : memref<16x1xf32, #tpu.memory_space<vmem>>, vector<16x1xf32>,
      %cst_43 = arith.constant 0.000000e+00 : f32
      %67 = vector.broadcast %cst_43 : f32 to vector<16x8xf32>
      %c0_44 = arith.constant 0 : index
      %c0_45 = arith.constant 0 : index
      %68 = vector.load %arg9[%c0_44, %c0_45] : memref<16x8xf32, #tpu.memory_space<vmem>>, vector<16x8xf32>
      tpu.vector_store %arg9[%c0_44, %c0_45], %67 {strides = array<i32>} : memref<16x8xf32, #tpu.memory_space<vmem>>, vector<16x8xf32>,
    } else {
    }
    %c0 = arith.constant 0 : index
    %c0_1 = arith.constant 0 : index
    %c0_2 = arith.constant 0 : index
    %c0_3 = arith.constant 0 : index
    %3 = vector.load %arg3[%c0, %c0_1, %c0_2, %c0_3] : memref<1x1x16x8xf32, #tpu.memory_space<vmem>>, vector<1x1x16x8xf32>
    %4 = vector.shape_cast %3 : vector<1x1x16x8xf32> to vector<16x8xf32>
    %cst = arith.constant 0.353553385 : f32
    %5 = vector.broadcast %cst : f32 to vector<16x8xf32>
    %6 = arith.mulf %4, %5 : vector<16x8xf32>
    %c0_4 = arith.constant 0 : index
    %c0_5 = arith.constant 0 : index
    %c0_6 = arith.constant 0 : index
    %c0_7 = arith.constant 0 : index
    %7 = vector.load %arg4[%c0_4, %c0_5, %c0_6, %c0_7] : memref<1x1x8x8xf32, #tpu.memory_space<vmem>>, vector<1x1x8x8xf32>
    %8 = vector.shape_cast %7 : vector<1x1x8x8xf32> to vector<8x8xf32>
    %c0_8 = arith.constant 0 : index
    %c0_9 = arith.constant 0 : index
    %c0_10 = arith.constant 0 : index
    %c0_11 = arith.constant 0 : index
    %9 = vector.load %arg5[%c0_8, %c0_9, %c0_10, %c0_11] : memref<1x1x8x8xf32, #tpu.memory_space<vmem>>, vector<1x1x8x8xf32>
    %10 = vector.shape_cast %9 : vector<1x1x8x8xf32> to vector<8x8xf32>
    %cst_12 = arith.constant dense<0.000000e+00> : vector<16x8xf32>
    %11 = tpu.matmul %6, %8, %cst_12 {dimension_numbers = #tpu.dot_dimension_numbers<[1], [1], [0], [0], [0, 0, 1, 0], [], []>} : vector<16x8xf32>, vector<8x8xf32>, vector<16x8xf32> -> vector<16x8xf32>
    %12 = tpu.iota {dimensions = array<i32: 0>} : vector<16x8xi32>
    %13 = tpu.iota {dimensions = array<i32: 1>} : vector<16x8xi32>
    %c8_i32 = arith.constant 8 : i32
    %c0_i32_13 = arith.constant 0 : i32
    %14 = arith.cmpi eq, %c8_i32, %c0_i32_13 : i32
    %c1_i32 = arith.constant 1 : i32
    %15 = arith.select %14, %c1_i32, %c8_i32 : i32
    %16 = vector.broadcast %15 : i32 to vector<16x8xi32>
    %17 = arith.remsi %12, %16 : vector<16x8xi32>
    %c0_i32_14 = arith.constant 0 : i32
    %18 = vector.broadcast %c0_i32_14 : i32 to vector<16x8xi32>
    %19 = arith.cmpi ne, %17, %18 : vector<16x8xi32>
    %c0_i32_15 = arith.constant 0 : i32
    %20 = vector.broadcast %c0_i32_15 : i32 to vector<16x8xi32>
    %21 = arith.cmpi slt, %17, %20 : vector<16x8xi32>
    %c0_i32_16 = arith.constant 0 : i32
    %22 = arith.cmpi slt, %15, %c0_i32_16 : i32
    %23 = vector.broadcast %22 : i1 to vector<16x8xi1>
    %24 = vector.broadcast %23 : vector<16x8xi1> to vector<16x8xi1>
    %25 = arith.xori %21, %24 : vector<16x8xi1>
    %26 = arith.andi %25, %19 : vector<16x8xi1>
    %27 = vector.broadcast %15 : i32 to vector<16x8xi32>
    %28 = arith.addi %17, %27 : vector<16x8xi32>
    %29 = arith.select %26, %28, %17 : vector<16x8xi1>, vector<16x8xi32>
    %c8_i32_17 = arith.constant 8 : i32
    %30 = vector.broadcast %c8_i32_17 : i32 to vector<16x8xi32>
    %31 = arith.addi %30, %29 : vector<16x8xi32>
    %c8_i32_18 = arith.constant 8 : i32
    %32 = arith.muli %arg2, %c8_i32_18 : i32
    %33 = vector.broadcast %32 : i32 to vector<16x8xi32>
    %34 = arith.addi %33, %13 : vector<16x8xi32>
    %35 = arith.cmpi sle, %34, %31 : vector<16x8xi32>
    %cst_19 = arith.constant -1.000000e+30 : f32
    %36 = vector.broadcast %cst_19 : f32 to vector<16x8xf32>
    %37 = arith.select %35, %11, %36 : vector<16x8xi1>, vector<16x8xf32>
    %c0_20 = arith.constant 0 : index
    %c0_21 = arith.constant 0 : index
    %38 = vector.load %arg7[%c0_20, %c0_21] : memref<16x1xf32, #tpu.memory_space<vmem>>, vector<16x1xf32>
    %cst_22 = arith.constant dense<0xFF800000> : vector<16xf32>
    %39 = vector.multi_reduction <maximumf>, %37, %cst_22 [1] : vector<16x8xf32> to vector<16xf32>
    %40 = vector.shape_cast %39 : vector<16xf32> to vector<16x1xf32>
    %41 = arith.maximumf %38, %40 : vector<16x1xf32>
    %42 = arith.subf %38, %41 : vector<16x1xf32>
    %43 = math.exp %42 : vector<16x1xf32>
    %44 = vector.broadcast %41 : vector<16x1xf32> to vector<16x8xf32>
    %45 = arith.subf %37, %44 : vector<16x8xf32>
    %46 = math.exp %45 : vector<16x8xf32>
    %c0_23 = arith.constant 0 : index
    %c0_24 = arith.constant 0 : index
    %47 = vector.load %arg8[%c0_23, %c0_24] : memref<16x1xf32, #tpu.memory_space<vmem>>, vector<16x1xf32>
    %48 = arith.mulf %43, %47 : vector<16x1xf32>
    %cst_25 = arith.constant dense<0.000000e+00> : vector<16xf32>
    %49 = vector.multi_reduction <add>, %46, %cst_25 [1] : vector<16x8xf32> to vector<16xf32>
    %50 = vector.shape_cast %49 : vector<16xf32> to vector<16x1xf32>
    %51 = arith.addf %48, %50 : vector<16x1xf32>
    %c0_26 = arith.constant 0 : index
    %c0_27 = arith.constant 0 : index
    %52 = vector.load %arg8[%c0_26, %c0_27] : memref<16x1xf32, #tpu.memory_space<vmem>>, vector<16x1xf32>
    tpu.vector_store %arg8[%c0_26, %c0_27], %51 {strides = array<i32>} : memref<16x1xf32, #tpu.memory_space<vmem>>, vector<16x1xf32>,
    %c0_28 = arith.constant 0 : index
    %c0_29 = arith.constant 0 : index
    %53 = vector.load %arg9[%c0_28, %c0_29] : memref<16x8xf32, #tpu.memory_space<vmem>>, vector<16x8xf32>
    %54 = vector.broadcast %43 : vector<16x1xf32> to vector<16x8xf32>
    %55 = arith.mulf %54, %53 : vector<16x8xf32>
    %cst_30 = arith.constant dense<0.000000e+00> : vector<16x8xf32>
    %56 = tpu.matmul %46, %10, %cst_30 {dimension_numbers = #tpu.dot_dimension_numbers<[1], [0], [0], [1], [0, 0, 1, 1], [], []>} : vector<16x8xf32>, vector<8x8xf32>, vector<16x8xf32> -> vector<16x8xf32>
    %57 = arith.addf %55, %56 : vector<16x8xf32>
    %c0_31 = arith.constant 0 : index
    %c0_32 = arith.constant 0 : index
    %58 = vector.load %arg9[%c0_31, %c0_32] : memref<16x8xf32, #tpu.memory_space<vmem>>, vector<16x8xf32>
    tpu.vector_store %arg9[%c0_31, %c0_32], %57 {strides = array<i32>} : memref<16x8xf32, #tpu.memory_space<vmem>>, vector<16x8xf32>,
    %c0_33 = arith.constant 0 : index
    %c0_34 = arith.constant 0 : index
    %59 = vector.load %arg7[%c0_33, %c0_34] : memref<16x1xf32, #tpu.memory_space<vmem>>, vector<16x1xf32>
    tpu.vector_store %arg7[%c0_33, %c0_34], %41 {strides = array<i32>} : memref<16x1xf32, #tpu.memory_space<vmem>>, vector<16x1xf32>,
    %c1_i32_35 = arith.constant 1 : i32
    %60 = arith.cmpi eq, %arg2, %c1_i32_35 : i32
    %61 = arith.extui %60 : i1 to i32
    %c0_i32_36 = arith.constant 0 : i32
    %62 = arith.cmpi ne, %61, %c0_i32_36 : i32
    scf.if %62 {
      %c0_37 = arith.constant 0 : index
      %c0_38 = arith.constant 0 : index
      %63 = vector.load %arg9[%c0_37, %c0_38] : memref<16x8xf32, #tpu.memory_space<vmem>>, vector<16x8xf32>
      %c0_39 = arith.constant 0 : index
      %c0_40 = arith.constant 0 : index
      %64 = vector.load %arg8[%c0_39, %c0_40] : memref<16x1xf32, #tpu.memory_space<vmem>>, vector<16x1xf32>
      %65 = tpu.reciprocal %64 : vector<16x1xf32> -> vector<16x1xf32>
      %66 = vector.broadcast %65 : vector<16x1xf32> to vector<16x8xf32>
      %67 = arith.mulf %63, %66 : vector<16x8xf32>
      %c0_41 = arith.constant 0 : index
      %c0_42 = arith.constant 0 : index
      %c0_43 = arith.constant 0 : index
      %c0_44 = arith.constant 0 : index
      %68 = vector.load %arg6[%c0_41, %c0_42, %c0_43, %c0_44] : memref<1x1x16x8xf32, #tpu.memory_space<vmem>>, vector<1x1x16x8xf32>
      %69 = vector.shape_cast %68 : vector<1x1x16x8xf32> to vector<16x8xf32>
      %70 = vector.shape_cast %67 : vector<16x8xf32> to vector<1x1x16x8xf32>
      tpu.vector_store %arg6[%c0_41, %c0_42, %c0_43, %c0_44], %70 {strides = array<i32>} : memref<1x1x16x8xf32, #tpu.memory_space<vmem>>, vector<1x1x16x8xf32>,
    } else {
    }
    return
  }
  func.func @transform_0(%arg0: i32, %arg1: i32, %arg2: i32) -> (i32, i32, i32, i32) {
    %c0_i32 = arith.constant 0 : i32
    %c0_i32_0 = arith.constant 0 : i32
    %c0_i32_1 = arith.constant 0 : i32
    return %arg0, %arg1, %c0_i32, %c0_i32_0 : i32, i32, i32, i32
  }
  func.func @transform_1(%arg0: i32, %arg1: i32, %arg2: i32) -> (i32, i32, i32, i32) {
    %c0_i32 = arith.constant 0 : i32
    %c0_i32_0 = arith.constant 0 : i32
    return %arg0, %arg1, %arg2, %c0_i32 : i32, i32, i32, i32
  }
  func.func @transform_2(%arg0: i32, %arg1: i32, %arg2: i32) -> (i32, i32, i32, i32) {
    %c0_i32 = arith.constant 0 : i32
    %c0_i32_0 = arith.constant 0 : i32
    return %arg0, %arg1, %arg2, %c0_i32 : i32, i32, i32, i32
  }
  func.func @transform_3(%arg0: i32, %arg1: i32, %arg2: i32) -> (i32, i32, i32, i32) {
    %c0_i32 = arith.constant 0 : i32
    %c0_i32_0 = arith.constant 0 : i32
    %c0_i32_1 = arith.constant 0 : i32
    return %arg0, %arg1, %c0_i32, %c0_i32_0 : i32, i32, i32, i32
  }
}

</mosaic_0001>

<bundles_post_ra>
// kernel: _attention_forward.6
= control target key start
LH: loop header
LB: loop body
LE: loop exit
PB: predicated region body
PF: predicated region fallthrough
CT: control target
= control target key end

     0   :  { %7 = vsyncpa [#allocation4], 0  ;;  %s260_s0 = inlined_call_operand.hbm [shape: f32[16,32], index: 0, kind: input, shape index: {}]   ;;  %s261_s1 = inlined_call_operand.hbm [shape: f32[16,32], index: 1, kind: input, shape index: {}]   ;;  %s262_s2 = inlined_call_operand.vmem [shape: f32[16,16], index: 2, kind: output, shape index: {}]  }
   0x1   :  { %8 = vsyncpa [#allocation6], 0  ;;  %s222_s9 = smov [#allocation3]  }
   0x2   :  { %s14_s10 = sshll.u32 %s222_s9, 4  ;;  %s15_s10 = int_to_ptr.vmem [resolvable:$true] %s14_s10 }
   0x3   :  { %s186_s11 = scalar_lea.vmem %s15_s10, 256  ;;  %p191_p1 = scmp.lt.s32.totalorder %s15_s10, %s15_s10 }
   0x4   :  { %p187_p0 = scmp.ne.s32.totalorder %s15_s10, %s186_s11  ;;  %p192_p2 = scmp.lt.s32.totalorder %s186_s11, %s186_s11 }
   0x6   :  { %p193_p3 = por %p192_p2, %p191_p1 }
   0x8   :  { %p194_p4 = pnand %p193_p3, %p187_p0 }
   0xa   :  { %197 = shalt.err (!%p194_p4)
}
   0xb   :  { %s223_s12 = smov 128   ;;  %s224_s13 = smov 8  }
   0xc   :  { %20 = dma.hbm_to_vmem [thread:$0]  %s260_s0, 256, %s15_s10, [#allocation4], %s223_s12, %s223_s12, %s224_s13  }
   0xd   :  { %s225_s16 = smov [#allocation5]  }
   0xe   :  { %s26_s17 = sshll.u32 %s225_s16, 4  ;;  %s27_s17 = int_to_ptr.vmem [resolvable:$true] %s26_s17 }
   0xf   :  { %s206_s18 = scalar_lea.vmem %s27_s17, 256  ;;  %p211_p6 = scmp.lt.s32.totalorder %s27_s17, %s27_s17 }
  0x10   :  { %p207_p5 = scmp.ne.s32.totalorder %s27_s17, %s206_s18  ;;  %p212_p7 = scmp.lt.s32.totalorder %s206_s18, %s206_s18 }
  0x12   :  { %p213_p8 = por %p212_p7, %p211_p6 }
  0x14   :  { %p214_p9 = pnand %p213_p8, %p207_p5 }
  0x16   :  { %217 = shalt.err (!%p214_p9)
}
  0x17   :  { %32 = dma.hbm_to_vmem [thread:$0]  %s261_s1, 256, %s27_s17, [#allocation6], %s223_s12, %s223_s12, %s224_s13  }
  0x18   :  { %218 = dma.done.wait [#allocation4], 256  }
  0x19   :  { %219 = vsyncadd [#allocation4], 4294967040 }
  0x1a   :  { %220 = dma.done.wait [#allocation6], 256  }
  0x1b   :  { %221 = vsyncadd [#allocation6], 4294967040  ;;  %vm43_vm0 = vcmask 130048   ;;  %v226_v0 = vmov 0.0   ;;  %vm52_vm1 = vcmask 261120   ;;  %v51_v1 = vld [vmem:[#allocation5 + $0x8] sm:$0xff] }
  0x1c   :  { %45 = vst.msk [vmem:[#allocation2 + $0x8] sm:$0xff] %vm43_vm0, %v226_v0  ;;  %44 = vst.msk [vmem:[#allocation2] sm:$0xff] %vm43_vm0, %v226_v0  ;;  %v50_v2 = vld [vmem:[#allocation5] sm:$0xff]  ;;  %v48_v3 = vld [vmem:[#allocation3] sm:$0xff]  ;;  %166 = vmatprep.subr.msk.mxu0 %vm52_vm1, %v51_v1 }
  0x1d   :  { %170 = vmatprep.mubr.msk.f32.mxu0 %vm52_vm1, %v48_v3  ;;  %167 = vmatpush3.xpose.msk.msra.mxu0 %vm52_vm1, %v51_v1  ;;  %v49_v4 = vld [vmem:[#allocation3 + $0x8] sm:$0xff] }
  0x1e   :  { %168 = vmatprep.subr.msk.mxu0 %vm52_vm1, %v50_v2 }
  0x21   :  { %169 = vmatpush3.xpose.msk.msra.mxu0 %vm52_vm1, %v50_v2 }
  0x23   :  { %v47_v5 = vld [vmem:[#allocation2 + $0x8] sm:$0xff]  ;;  %v46_v7 = vld [vmem:[#allocation2] sm:$0xff] }
  0x24   :  { %171 = vmatmul.mubr.msk.f32.vlgmr.msra.gmra.mxu0 %vm52_vm1, %v49_v4 }
  0xe4   :  { %v172_v6 = vpop.f32.mrf.mxu0 }
  0xe5   :  { %v141_v8 = vadd.f32 %v172_v6, %v47_v5 }
  0xe6   :  { %v131_v9 = vpop.f32.mrf.mxu0 }
  0xe7   :  { %144 = vst.msk [vmem:[#allocation2 + $0x8] sm:$0xff] %vm43_vm0, %v141_v8  ;;  %v140_v10 = vadd.f32 %v131_v9, %v46_v7 }
  0xe9   :  { %143 = vst.msk [vmem:[#allocation2] sm:$0xff] %vm43_vm0, %v140_v10 }
  0xee   :  { %v149_v11 = vld [vmem:[#allocation2 + $0x8] sm:$0xff] }
  0xef   :  { %151 = vst.msk [vmem:[%s262_s2 + $0x8] sm:$0xff] %vm43_vm0, %v149_v11 }
  0xf0   :  { %v148_v12 = vld [vmem:[#allocation2] sm:$0xff] }
  0xf1   :  { %150 = vst.msk [vmem:[%s262_s2] sm:$0xff] %vm43_vm0, %v148_v12 }
  0xf2   :  { %156 = vsyncpa [#allocation4], 1 }
  0xf3   :  { %157 = vsyncpa [#allocation6], 1 }

// kernel: _attention_forward.5
= control target key start
LH: loop header
LB: loop body
LE: loop exit
PB: predicated region body
PF: predicated region fallthrough
CT: control target
= control target key end

     0   :  { %vm15_vm0 = vcmask 261120   ;;  %v159_v2 = vmov 0.0   ;;  %s215_s1 = inlined_call_operand.vmem [shape: f32[32,32], index: 1, kind: input, shape index: {}]   ;;  %s216_s0 = inlined_call_operand.vmem [shape: f32[16,32], index: 0, kind: input, shape index: {}]   ;;  %s217_s2 = inlined_call_operand.vmem [shape: f32[16,32], index: 2, kind: output, shape index: {}]  }
   0x1   :  { %v25_v0 = vld [vmem:[%s215_s1 + $0x18] sm:$0xff]  ;;  %v24_v1 = vld [vmem:[%s215_s1 + $0x10] sm:$0xff]  ;;  %17 = vst.msk [vmem:[#allocation2 + $0x8] sm:$0xff] %vm15_vm0, %v159_v2  ;;  %16 = vst.msk [vmem:[#allocation2] sm:$0xff] %vm15_vm0, %v159_v2 }
   0x2   :  { %147 = vmatprep.subr.msk.mxu0 %vm15_vm0, %v25_v0  ;;  %v20_v3 = vld [vmem:[%s216_s0] sm:$0xff]  ;;  %v23_v4 = vld [vmem:[%s215_s1 + $0x8] sm:$0xff] }
   0x3   :  { %148 = vmatpush3.xpose.msk.msra.mxu0 %vm15_vm0, %v25_v0  ;;  %155 = vmatprep.mubr.msk.f32.mxu0 %vm15_vm0, %v20_v3  ;;  %v22_v5 = vld [vmem:[%s215_s1] sm:$0xff]  ;;  %v21_v6 = vld [vmem:[%s216_s0 + $0x8] sm:$0xff] }
   0x4   :  { %149 = vmatprep.subr.msk.mxu0 %vm15_vm0, %v24_v1 }
   0x7   :  { %150 = vmatpush3.xpose.msk.msra.mxu0 %vm15_vm0, %v24_v1 }
   0x8   :  { %151 = vmatprep.subr.msk.mxu0 %vm15_vm0, %v23_v4  ;;  %v19_v7 = vld [vmem:[#allocation2 + $0x8] sm:$0xff]  ;;  %v18_v9 = vld [vmem:[#allocation2] sm:$0xff] }
   0xb   :  { %152 = vmatpush3.xpose.msk.msra.mxu0 %vm15_vm0, %v23_v4 }
   0xc   :  { %153 = vmatprep.subr.msk.mxu0 %vm15_vm0, %v22_v5 }
   0xf   :  { %154 = vmatpush3.xpose.msk.msra.mxu0 %vm15_vm0, %v22_v5 }
  0x12   :  { %156 = vmatmul.mubr.msk.f32.vlgmr.msra.gmra.mxu0 %vm15_vm0, %v21_v6 }
  0xd2   :  { %v157_v8 = vpop.f32.mrf.mxu0 }
  0xd3   :  { %v121_v10 = vadd.f32 %v157_v8, %v19_v7 }
  0xd4   :  { %v111_v11 = vpop.f32.mrf.mxu0 }
  0xd5   :  { %123 = vst.msk [vmem:[#allocation2 + $0x8] sm:$0xff] %vm15_vm0, %v121_v10  ;;  %v120_v12 = vadd.f32 %v111_v11, %v18_v9 }
  0xd7   :  { %122 = vst.msk [vmem:[#allocation2] sm:$0xff] %vm15_vm0, %v120_v12 }
  0xdc   :  { %v128_v13 = vld [vmem:[#allocation2 + $0x8] sm:$0xff] }
  0xdd   :  { %130 = vst.msk [vmem:[%s217_s2 + $0x8] sm:$0xff] %vm15_vm0, %v128_v13 }
  0xde   :  { %v127_v14 = vld [vmem:[#allocation2] sm:$0xff] }
  0xdf   :  { %129 = vst.msk [vmem:[%s217_s2] sm:$0xff] %vm15_vm0, %v127_v14 }

// kernel: _attention_forward.7
= control target key start
LH: loop header
LB: loop body
LE: loop exit
PB: predicated region body
PF: predicated region fallthrough
CT: control target
= control target key end

     0   :  { %vm24_vm0 = vcmask 261120   ;;  %vm15_vm1 = vcmask 130048   ;;  %v144_v3 = vmov 0.0   ;;  %s184_s1 = inlined_call_operand.vmem [shape: f32[16,32], index: 1, kind: input, shape index: {}]   ;;  %s185_s0 = inlined_call_operand.vmem [shape: f32[16,32], index: 0, kind: input, shape index: {}]   ;;  %s186_s2 = inlined_call_operand.vmem [shape: f32[16,16], index: 2, kind: output, shape index: {}]  }
   0x1   :  { %v22_v0 = vld [vmem:[%s184_s1] sm:$0xff]  ;;  %v23_v1 = vld [vmem:[%s184_s1 + $0x8] sm:$0xff]  ;;  %17 = vst.msk [vmem:[#allocation2 + $0x8] sm:$0xff] %vm15_vm1, %v144_v3  ;;  %16 = vst.msk [vmem:[#allocation2] sm:$0xff] %vm15_vm1, %v144_v3 }
   0x2   :  { %v20_v2 = vld [vmem:[%s185_s0] sm:$0xff]  ;;  %136 = vmatprep.subr.msk.mxu0 %vm24_vm0, %v23_v1  ;;  %v21_v4 = vld [vmem:[%s185_s0 + $0x8] sm:$0xff] }
   0x3   :  { %140 = vmatprep.mubr.msk.f32.mxu0 %vm24_vm0, %v20_v2  ;;  %137 = vmatpush3.xpose.msk.msra.mxu0 %vm24_vm0, %v23_v1 }
   0x4   :  { %138 = vmatprep.subr.msk.mxu0 %vm24_vm0, %v22_v0 }
   0x7   :  { %139 = vmatpush3.xpose.msk.msra.mxu0 %vm24_vm0, %v22_v0 }
   0x8   :  { %v19_v5 = vld [vmem:[#allocation2 + $0x8] sm:$0xff]  ;;  %v18_v7 = vld [vmem:[#allocation2] sm:$0xff] }
   0xa   :  { %141 = vmatmul.mubr.msk.f32.vlgmr.msra.gmra.mxu0 %vm24_vm0, %v21_v4 }
  0xca   :  { %v142_v6 = vpop.f32.mrf.mxu0 }
  0xcb   :  { %v113_v8 = vadd.f32 %v142_v6, %v19_v5 }
  0xcc   :  { %v103_v9 = vpop.f32.mrf.mxu0 }
  0xcd   :  { %116 = vst.msk [vmem:[#allocation2 + $0x8] sm:$0xff] %vm15_vm1, %v113_v8  ;;  %v112_v10 = vadd.f32 %v103_v9, %v18_v7 }
  0xcf   :  { %115 = vst.msk [vmem:[#allocation2] sm:$0xff] %vm15_vm1, %v112_v10 }
  0xd4   :  { %v121_v11 = vld [vmem:[#allocation2 + $0x8] sm:$0xff] }
  0xd5   :  { %123 = vst.msk [vmem:[%s186_s2 + $0x8] sm:$0xff] %vm15_vm1, %v121_v11 }
  0xd6   :  { %v120_v12 = vld [vmem:[#allocation2] sm:$0xff] }
  0xd7   :  { %122 = vst.msk [vmem:[%s186_s2] sm:$0xff] %vm15_vm1, %v120_v12 }

// kernel: _attention_forward.9
= control target key start
LH: loop header
LB: loop body
LE: loop exit
PB: predicated region body
PF: predicated region fallthrough
CT: control target
= control target key end

     0   :  { %vm16_vm0 = vcmask 261120   ;;  %v197_v3 = vmov 0.0   ;;  %s253_s0 = inlined_call_operand.vmem [shape: f32[16,32], index: 0, kind: input, shape index: {}]   ;;  %s254_s1 = inlined_call_operand.vmem [shape: f32[32,32], index: 1, kind: input, shape index: {}]   ;;  %s255_s2 = inlined_call_operand.hbm [shape: f32[16,32], index: 2, kind: output, shape index: {}]  }
   0x1   :  { %v26_v0 = vld [vmem:[%s254_s1 + $0x18] sm:$0xff]  ;;  %v25_v1 = vld [vmem:[%s254_s1 + $0x10] sm:$0xff]  ;;  %v21_v2 = vld [vmem:[%s253_s0] sm:$0xff]  ;;  %18 = vst.msk [vmem:[#allocation2 + $0x8] sm:$0xff] %vm16_vm0, %v197_v3 }
   0x2   :  { %160 = vmatprep.subr.msk.mxu0 %vm16_vm0, %v26_v0  ;;  %17 = vst.msk [vmem:[#allocation2] sm:$0xff] %vm16_vm0, %v197_v3  ;;  %168 = vmatprep.mubr.msk.f32.mxu0 %vm16_vm0, %v21_v2 }
   0x3   :  { %161 = vmatpush3.xpose.msk.msra.mxu0 %vm16_vm0, %v26_v0 }
   0x4   :  { %7 = vsyncpa [#allocation4], 0  ;;  %162 = vmatprep.subr.msk.mxu0 %vm16_vm0, %v25_v1  ;;  %v24_v4 = vld [vmem:[%s254_s1 + $0x8] sm:$0xff]  ;;  %v23_v5 = vld [vmem:[%s254_s1] sm:$0xff]  ;;  %s198_s1 = smov [#allocation3]  }
   0x5   :  { %v22_v6 = vld [vmem:[%s253_s0 + $0x8] sm:$0xff]  ;;  %s137_s21 = sshll.u32 %s198_s1, 4  ;;  %s138_s21 = int_to_ptr.vmem [resolvable:$true] %s137_s21 }
   0x6   :  { %s175_s0 = scalar_lea.vmem %s138_s21, 256  ;;  %p180_p1 = scmp.lt.s32.totalorder %s138_s21, %s138_s21 }
   0x7   :  { %163 = vmatpush3.xpose.msk.msra.mxu0 %vm16_vm0, %v25_v1  ;;  %p176_p0 = scmp.ne.s32.totalorder %s138_s21, %s175_s0  ;;  %p181_p2 = scmp.lt.s32.totalorder %s175_s0, %s175_s0 }
   0x8   :  { %164 = vmatprep.subr.msk.mxu0 %vm16_vm0, %v24_v4  ;;  %v20_v7 = vld [vmem:[#allocation2 + $0x8] sm:$0xff] }
   0x9   :  { %v19_v9 = vld [vmem:[#allocation2] sm:$0xff]  ;;  %p182_p3 = por %p181_p2, %p180_p1 }
   0xb   :  { %165 = vmatpush3.xpose.msk.msra.mxu0 %vm16_vm0, %v24_v4  ;;  %p183_p4 = pnand %p182_p3, %p176_p0 }
   0xc   :  { %166 = vmatprep.subr.msk.mxu0 %vm16_vm0, %v23_v5 }
   0xf   :  { %167 = vmatpush3.xpose.msk.msra.mxu0 %vm16_vm0, %v23_v5 }
  0x12   :  { %169 = vmatmul.mubr.msk.f32.vlgmr.msra.gmra.mxu0 %vm16_vm0, %v22_v6 }
  0xd2   :  { %v170_v8 = vpop.f32.mrf.mxu0 }
  0xd3   :  { %v122_v10 = vadd.f32 %v170_v8, %v20_v7 }
  0xd4   :  { %v112_v11 = vpop.f32.mrf.mxu0 }
  0xd5   :  { %124 = vst.msk [vmem:[#allocation2 + $0x8] sm:$0xff] %vm16_vm0, %v122_v10  ;;  %v121_v12 = vadd.f32 %v112_v11, %v19_v9 }
  0xd7   :  { %123 = vst.msk [vmem:[#allocation2] sm:$0xff] %vm16_vm0, %v121_v12 }
  0xdc   :  { %v129_v13 = vld [vmem:[#allocation2 + $0x8] sm:$0xff] }
  0xdd   :  { %131 = vst.msk [vmem:[#allocation3 + $0x8] sm:$0xff] %vm16_vm0, %v129_v13 }
  0xde   :  { %v128_v14 = vld [vmem:[#allocation2] sm:$0xff] }
  0xdf   :  { %130 = vst.msk [vmem:[#allocation3] sm:$0xff] %vm16_vm0, %v128_v14 }
  0xe0   :  { %186 = shalt.err (!%p183_p4)
}
  0xe1   :  { %s199_s22 = smov 128   ;;  %s200_s23 = smov 8  }
  0xe2   :  { %143 = dma.vmem_to_hbm [thread:$0]  %s138_s21, 256, %s255_s2, [#allocation4], %s199_s22, %s199_s22, %s200_s23  }
  0xe3   :  { %195 = dma.done.wait [#allocation4], 256  }
  0xe4   :  { %196 = vsyncadd [#allocation4], 4294967040 }
  0xe5   :  { %147 = vsyncpa [#allocation4], 1 }

// kernel: _attention_forward.8
= control target key start
LH: loop header
LB: loop body
LE: loop exit
PB: predicated region body
PF: predicated region fallthrough
CT: control target
= control target key end

     0   :  { %s964_s12 = smov 0   ;;  %s966_s13 = smov 0   ;;  %s1071_s0 = inlined_call_operand.vmem [shape: f32[2,2,16,8], index: 0, kind: input, shape index: {}]   ;;  %s1072_s1 = inlined_call_operand.vmem [shape: f32[2,2,16,8], index: 1, kind: input, shape index: {}]   ;;  %s1073_s2 = inlined_call_operand.vmem [shape: f32[2,2,16,8], index: 2, kind: input, shape index: {}]   ;;  %s1074_s3 = inlined_call_operand.vmem [shape: f32[2,2,16,8], index: 3, kind: output, shape index: {}]  }
   0x1   :  { %s968_s14 = smov 0   ;;  %s970_s15 = smov 0  }
   0x2   :  { %s972_s16 = smov 0   ;;  %s974_s17 = smov 0  }
   0x3   :  { %s976_s18 = smov 0  }
   0x4 LB: > { %s25_s19 = sadd.s32 1, %s926_s15  ;;  %s28_s20 = sadd.s32 1, %s930_s16  ;;  %s938_s18 = sphi %s976_s18, %s13_s18   ;;  %s934_s17 = sphi %s974_s17, %s1080_s17   ;;  %s930_s16 = sphi %s972_s16, %s1079_s16   ;;  %s926_s15 = sphi %s970_s15, %s1078_s15   ;;  %s922_s14 = sphi %s968_s14, %s1077_s14   ;;  %s918_s13 = sphi %s966_s13, %s1076_s13   ;;  %s914_s12 = sphi %s964_s12, %s1075_s12  }
   0x5   : > { %p26_p0 = scmp.ge.s32.totalorder %s25_s19, 2  ;;  %p770_p1 = scmp.ge.s32.totalorder %s938_s18, 1 }
   0x6   : > { %p206_p2 = scmp.lt.s32.totalorder %s938_s18, 9  ;;  %s32_s21 = sadd.s32 1, %s934_s17 }
   0x7   : > { %s1082_s19 = smov (%p26_p0, %s25_s19), 0  ;;  %s1084_s20 = smov (!%p26_p0, %s28_s20), %s930_s16 }
   0x8   : > { %p207_p3 = pnand %p770_p1, %p206_p2  ;;  %p30_p4 = scmp.ge.s32.totalorder %s1084_s20, 2 }
   0x9   : > { %p262_p6 = scmp.lt.s32.totalorder (!%p207_p3), %s922_s14, 1  ;;  %p264_p7 = scmp.lt.s32.totalorder (!%p207_p3), %s918_s13, 1 }
   0xa   : > { %s1086_s20 = smov (%p30_p4, %s1084_s20), 0  ;;  %s1088_s21 = smov (!%p30_p4, %s32_s21), %s934_s17 }
   0xb   : > { %p34_p5 = scmp.ge.s32.totalorder %s1088_s21, 2  ;;  %210 = sbr.rel (%p207_p3) target bundleno = 863 (0x35f), region = 32 }
   0xc   : > { %p275_p8 = scmp.lt.s32.totalorder (!%p207_p3), %s914_s12, 1  ;;  %p783_p9 = scmp.ne.s32.totalorder (!%p207_p3), %s914_s12, 0 }
   0xd   : > { %s1090_s21 = smov (%p34_p5, %s1088_s21), 0 }
  0x10   : > { %s1092_s14 = smov (!%p262_p6, %s922_s14), 1  ;;  %s1094_s13 = smov (!%p264_p7, %s918_s13), 1 }
  0x11   : > { %s772_s22 = sshll.u32 %s1092_s14, 2  ;;  %s771_s23 = sshll.u32 %s1094_s13, 1 }
  0x12   : > { %s268_s24 = sadd.s32 %s772_s22, %s771_s23 }
  0x13   : > { %s773_s25 = sshll.u32 %s268_s24, 3 }
  0x14   : > { %s270_s28 = scalar_lea.vmem %s1071_s0, %s773_s25  ;;  %s1015_s4 = scalar_lea.vmem %s1074_s3, %s773_s25 }
  0x15   : > { %s276_s5 = scalar_select %p275_p8, %s914_s12, 1 }
  0x16   : > { %307 = sbr.rel (%p783_p9) target bundleno = 31 (0x1f), region = 36 }
  0x17   : > { %s278_s6 = sadd.s32 %s771_s23, %s276_s5 }
  0x18   : > { %s280_s7 = sadd.s32 %s772_s22, %s278_s6 }
  0x19   : > { %s776_s8 = sshll.u32 %s280_s7, 3 }
  0x1a   : > { %s282_s11 = scalar_lea.vmem %s1072_s1, %s776_s8  ;;  %s1024_s24 = scalar_lea.vmem %s1073_s2, %s776_s8 }
  0x1b   : > { %vm308_vm0 = vcmask 7168   ;;  %vm313_vm1 = vcmask 64512   ;;  %v940_v0 = vmov -inf   ;;  %v941_v1 = vmov 0.0  }
  0x1c   : > { %309 = vst.msk [vmem:[#allocation2] sm:$0xff] %vm308_vm0, %v940_v0  ;;  %310 = vst.msk [vmem:[#allocation2 + $0x8] sm:$0xff] %vm308_vm0, %v940_v0 }
  0x1d   : > { %311 = vst.msk [vmem:[#allocation3] sm:$0xff] %vm308_vm0, %v941_v1  ;;  %312 = vst.msk [vmem:[#allocation3 + $0x8] sm:$0xff] %vm308_vm0, %v941_v1 }
  0x1e   : > { %314 = vst.msk [vmem:[#allocation4] sm:$0xff] %vm313_vm1, %v941_v1  ;;  %315 = vst.msk [vmem:[#allocation4 + $0x8] sm:$0xff] %vm313_vm1, %v941_v1 }
  0x1f PF: > { %v320_v2 = vld [vmem:[%s282_s11] sm:$0xff]  ;;  %vm322_vm2 = vcmask 64512   ;;  %v317_v4 = vld [vmem:[%s270_s28 + $0x8] sm:$0xff]  ;;  %v407_v7 = vlaneseq  ;;  %s787_s22 = sshll.u32 %s914_s12, 3  ;;  %v942_v23 = vmov 0   ;;  %vm489_vm5 = vcmask 7168  }
  0x20   : > { %v316_v3 = vld [vmem:[%s270_s28] sm:$0xff]  ;;  %799 = vmatprep.subr.msk.mxu0 %vm322_vm2, %v320_v2  ;;  %v319_v6 = vmul.f32 0.35355338, %v317_v4  ;;  %v439_v13 = vstv %s787_s22  ;;  %869 = vset.pattern.permute.xlu1 %v942_v23  ;;  %p790_p10 = scmp.ne.s32.totalorder %s914_s12, 1 }
  0x21   : > { %v318_v5 = vmul.f32 0.35355338, %v316_v3  ;;  %800 = vmatpush3.xpose.msk.msra.mxu0 %vm322_vm2, %v320_v2  ;;  %v408_v8 = vshrl.u32 %v407_v7, 7  ;;  %v411_v11 = vand.u32 127, %v407_v7  ;;  %870 = vset.pattern.permute.xlu0 %v942_v23  ;;  %v321_v32 = vld [vmem:[%s1024_s24] sm:$0xff] }
  0x22   : > { %804 = vmatprep.subr.mxu1 %v321_v32 }
  0x23   : > { %801 = vmatprep.mubr.msk.f32.mxu0 %vm322_vm2, %v318_v5  ;;  %v409_v9 = vadd.s32 8, %v408_v8  ;;  %v416_v10 = vand.u32 7, %v408_v8  ;;  %v440_v16 = vadd.s32 %v439_v13, %v411_v11  ;;  %v445_v24 = vld [vmem:[#allocation2] sm:$0xff]  ;;  %v446_v27 = vld [vmem:[#allocation2 + $0x8] sm:$0xff]  ;;  %805 = vmatpush3.msra.mxu1 %v321_v32 }
  0x24   : > { %802 = vmatmul.mubr.msk.f32.vlgmr.msra.gmra.mxu0 %vm322_vm2, %v319_v6  ;;  %v477_v47 = vld [vmem:[#allocation3] sm:$0xff]  ;;  %v478_v50 = vld [vmem:[#allocation3 + $0x8] sm:$0xff] }
  0x25   : > { %v423_v12 = vand.u32 7, %v409_v9  ;;  %v436_v14 = vadd.s32 8, %v416_v10  ;;  %v493_v55 = vld [vmem:[#allocation4 + $0x8] sm:$0xff]  ;;  %v492_v57 = vld [vmem:[#allocation4] sm:$0xff] }
  0x27   : > { %v437_v15 = vadd.s32 8, %v423_v12  ;;  %vm441_vm3 = vcmp.le.s32.totalorder %v440_v16, %v436_v14 }
  0x29   : > { %vm442_vm4 = vcmp.le.s32.totalorder %v440_v16, %v437_v15 }
  0xe4   : > { %v803_v17 = vpop.f32.mrf.mxu0 }
  0xe5   : > { %v444_v21 = vsel %vm442_vm4, %v803_v17, -1e+30 }
  0xe6   : > { %v398_v18 = vpop.f32.mrf.mxu0  ;;  %v450_v22 = vsel %vm322_vm2, %v444_v21, -inf }
  0xe7   : > { %v443_v19 = vsel %vm441_vm3, %v398_v18, -1e+30 }
  0xe8   : > { %v447_v20 = vsel %vm322_vm2, %v443_v19, -inf }
  0xe9   : > { %448 = vmax.xlane.f32.xlu0 %v447_v20 }
  0xed   : > { %451 = vmax.xlane.f32.xlu0 %v450_v22 }
 0x172   : > { %v449_v25 = vpop.xlane.xlu0 %448 }
 0x173   : > { %v453_v26 = vmax.f32 %v445_v24, %v449_v25 }
 0x175   : > { %v455_v28 = vsub.f32 %v445_v24, %v453_v26  ;;  %591 = vst.msk [vmem:[#allocation2] sm:$0xff] %vm489_vm5, %v453_v26  ;;  %463 = vperm.xlu1 %869, %v453_v26  }
 0x176   : > { %v452_v29 = vpop.xlane.xlu0 %451 }
 0x177   : > { %v454_v30 = vmax.f32 %v446_v27, %v452_v29  ;;  %v457_v44 = vmul.f32 1.442695, %v455_v28 }
 0x179   : > { %v456_v31 = vsub.f32 %v446_v27, %v454_v30  ;;  %592 = vst.msk [vmem:[#allocation2 + $0x8] sm:$0xff] %vm489_vm5, %v454_v30  ;;  %468 = vperm.xlu1 %869, %v454_v30  }
 0x17b   : > { %v459_v42 = vmul.f32 1.442695, %v456_v31 }
 0x1f0   : > { %v464_v33 = vpop.permute.xlu1 %463 }
 0x1f1   : > { %v471_v34 = vsub.f32 %v443_v19, %v464_v33 }
 0x1f3   : > { %v473_v35 = vmul.f32 1.442695, %v471_v34 }
 0x1f4   : > { %v469_v36 = vpop.permute.xlu1 %468 }
 0x1f5   : > { %871 = vpow2.f32 %v473_v35  ;;  %v472_v37 = vsub.f32 %v444_v21, %v469_v36 }
 0x1f7   : > { %v475_v38 = vmul.f32 1.442695, %v472_v37 }
 0x1f9   : > { %873 = vpow2.f32 %v475_v38 }
 0x1fa   : > { %875 = vpow2.f32 %v459_v42 }
 0x1fb   : > { %877 = vpow2.f32 %v457_v44 }
 0x202   : > { %v872_v39 = vpop.eup %871 }
 0x203   : > { %806 = vmatprep.mubr.msk.f32.mxu1 %vm322_vm2, %v872_v39  ;;  %v481_v40 = vsel %vm322_vm2, %v872_v39, 0.0 }
 0x204   : > { %482 = vadd.xlane.f32.xlu0 %v481_v40 }
 0x206   : > { %v874_v41 = vpop.eup %873 }
 0x207   : > { %807 = vmatmul.mubr.msk.f32.vlgmr.msra.gmra.mxu1 %vm322_vm2, %v874_v41  ;;  %v484_v43 = vsel %vm322_vm2, %v874_v41, 0.0  ;;  %v876_v45 = vpop.eup %875 }
 0x208   : > { %485 = vadd.xlane.f32.xlu1 %v484_v43  ;;  %v878_v46 = vpop.eup %877  ;;  %v480_v52 = vmul.f32 %v876_v45, %v478_v50 }
 0x209   : > { %v479_v48 = vmul.f32 %v878_v46, %v477_v47 }
 0x219   : > { %501 = vperm.xlu1 %869, %v876_v45  }
 0x21a   : > { %496 = vperm.xlu0 %870, %v878_v46  }
 0x28d   : > { %v483_v49 = vpop.xlane.xlu0 %482 }
 0x28e   : > { %v487_v51 = vadd.f32 %v483_v49, %v479_v48 }
 0x290   : > { %490 = vst.msk [vmem:[#allocation3] sm:$0xff] %vm489_vm5, %v487_v51 }
 0x291   : > { %v486_v53 = vpop.xlane.xlu1 %485 }
 0x292   : > { %v488_v54 = vadd.f32 %v486_v53, %v480_v52 }
 0x294   : > { %491 = vst.msk [vmem:[#allocation3 + $0x8] sm:$0xff] %vm489_vm5, %v488_v54 }
 0x295   : > { %v502_v56 = vpop.permute.xlu1 %501  ;;  %v497_v58 = vpop.permute.xlu0 %496 }
 0x296   : > { %v505_v59 = vmul.f32 %v502_v56, %v493_v55  ;;  %v504_v61 = vmul.f32 %v497_v58, %v492_v57 }
 0x2c7   : > { %v808_v60 = vpop.f32.mrf.mxu1 }
 0x2c8   : > { %v588_v62 = vadd.f32 %v808_v60, %v505_v59  ;;  %596 = sbr.rel (%p790_p10) target bundleno = 863 (0x35f), region = 40 }
 0x2c9   : > { %v578_v63 = vpop.f32.mrf.mxu1 }
 0x2ca   : > { %590 = vst.msk [vmem:[#allocation4 + $0x8] sm:$0xff] %vm322_vm2, %v588_v62  ;;  %v587_v0 = vadd.f32 %v578_v63, %v504_v61 }
 0x2cc   : > { %589 = vst.msk [vmem:[#allocation4] sm:$0xff] %vm322_vm2, %v587_v0 }
 0x2cd   : > { %v599_v1 = vld [vmem:[#allocation3] sm:$0xff]  ;;  %v600_v2 = vld [vmem:[#allocation3 + $0x8] sm:$0xff]  ;;  %v943_v3 = vmov 0  }
 0x2ce   : > { %879 = vset.pattern.permute.xlu0 %v943_v3  ;;  %880 = vrcp.f32 %v599_v1 }
 0x2cf   : > { %882 = vrcp.f32 %v600_v2 }
 0x2d1   : > { %v598_v9 = vld [vmem:[#allocation4 + $0x8] sm:$0xff] }
 0x2d3   : > { %v597_v6 = vld [vmem:[#allocation4] sm:$0xff] }
 0x2db   : > { %v881_v4 = vpop.eup %880 }
 0x2dc   : > { %605 = vperm.xlu0 %879, %v881_v4   ;;  %v883_v5 = vpop.eup %882 }
 0x2e0   : > { %610 = vperm.xlu0 %879, %v883_v5  }
 0x357   : > { %v606_v7 = vpop.permute.xlu0 %605 }
 0x358   : > { %v613_v8 = vmul.f32 %v606_v7, %v597_v6 }
 0x35a   : > { %615 = vst.msk [vmem:[%s1015_s4] sm:$0xff] %vm322_vm2, %v613_v8 }
 0x35b   : > { %v611_v10 = vpop.permute.xlu0 %610 }
 0x35c   : > { %v614_v11 = vmul.f32 %v611_v10, %v598_v9 }
 0x35e   : > { %616 = vst.msk [vmem:[%s1015_s4 + $0x8] sm:$0xff] %vm322_vm2, %v614_v11 }
 0x35f PF: > { %s13_s18 = sadd.s32 1, %s938_s18   ;;  %s1075_s12 = smov %s926_s15 }
 0x360   : > { %p10_p11 = scmp.ge.s32.totalorder %s13_s18, 10   ;;  %s1076_s13 = smov %s930_s16 }
 0x361   : > { %s1077_s14 = smov %s934_s17  ;;  %s1078_s15 = smov %s1082_s19 }
 0x362   : > { %s1079_s16 = smov %s1086_s20  ;;  %s1080_s17 = smov %s1090_s21 }
 0x363   :  { %12 = sbr.rel (!%p10_p11) target bundleno = 4 (0x4), region = 76 }

</bundles_post_ra>
